<compile_context>
chip_gen: v6e
topology: v6e:2x2x1
jax: 0.10.0
libtpu: 0.0.40
codegen_flags: <defaults>
</compile_context>

<pallas_src>
import functools

import jax
import jax.numpy as jnp
from jax import lax
from jax.experimental import pallas as pl
from jax.experimental.pallas import tpu as pltpu


# ---------------------------------------------------------------------------
# Fused kernel: channel mean/max pooling + 3x3 conv (2->1) + sigmoid
# ---------------------------------------------------------------------------
def _spatial_attention_kernel(x_ref, w_ref, b_ref, o_ref, pad_ref, *, H, W):
    # x_ref  : (1, C, H, W)  VMEM input block (one batch element)
    # w_ref  : (18,)         SMEM conv weights, torch order (o=0, c, kh, kw)
    # b_ref  : (1,)          SMEM conv bias
    # o_ref  : (1, 1, H, W)  VMEM output block
    # pad_ref: (2, H+2, W+2) VMEM scratch -- zero halo for the pooled maps
    x = x_ref[0]                           # (C, H, W)

    # Channel pooling (torch.mean / torch.max over dim=1). C is a leading axis,
    # so this is pure element-wise VPU work across vregs.
    avg = jnp.mean(x, axis=0)              # (H, W)
    mx = jnp.max(x, axis=0)                # (H, W)

    # In-kernel zero halo (replaces wrapper-side jnp.pad + HBM round trip).
    pad_ref[...] = jnp.zeros_like(pad_ref)
    pad_ref[0, 1:H + 1, 1:W + 1] = avg
    pad_ref[1, 1:H + 1, 1:W + 1] = mx

    # 3x3 conv on the 2-channel pooled map: 18 scalar-weight shifted FMAs,
    # fully unrolled so the scheduler can overlap loads and adds.
    acc = jnp.zeros((H, W), jnp.float32) + b_ref[0]
    for c in range(2):                     # c = 0: avg map, c = 1: max map
        for kh in range(3):
            for kw in range(3):
                acc = acc + w_ref[c * 9 + kh * 3 + kw] * pad_ref[c, kh:kh + H, kw:kw + W]

    o_ref[0, 0] = jax.nn.sigmoid(acc)


def spatial_attention(x, weight, bias):
    """x: (N, C, H, W) f32 (PyTorch NCHW); weight: (1, 2, 3, 3); bias: (1,)."""
    N, C, H, W = x.shape
    w_flat = weight.reshape(18).astype(jnp.float32)     # (o=0, c, kh, kw) flat
    b = bias.reshape(1).astype(jnp.float32)

    kernel = functools.partial(_spatial_attention_kernel, H=H, W=W)
    return pl.pallas_call(
        kernel,
        out_shape=jax.ShapeDtypeStruct((N, 1, H, W), jnp.float32),
        grid=(N,),
        in_specs=[
            pl.BlockSpec((1, C, H, W), lambda n: (n, 0, 0, 0)),
            pl.BlockSpec(memory_space=pltpu.MemorySpace.SMEM),   # conv weights
            pl.BlockSpec(memory_space=pltpu.MemorySpace.SMEM),   # conv bias
        ],
        out_specs=pl.BlockSpec((1, 1, H, W), lambda n: (n, 0, 0, 0)),
        scratch_shapes=[pltpu.VMEM((2, H + 2, W + 2), jnp.float32)],
        compiler_params=pltpu.CompilerParams(
            dimension_semantics=("parallel",),            # batch -> both TCs on v7x
            vmem_limit_bytes=32 * 1024 * 1024),           # < 64 MiB v7x VMEM
    )(x, w_flat, b)


# ---------------------------------------------------------------------------
# Pure-JAX reference (correctness check)
# ---------------------------------------------------------------------------
def spatial_attention_ref(x, weight, bias):
    avg = jnp.mean(x, axis=1, keepdims=True)
    mx = jnp.max(x, axis=1, keepdims=True)
    xc = jnp.concatenate([avg, mx], axis=1)               # (N, 2, H, W)
    y = lax.conv_general_dilated(
        xc, weight, window_strides=(1, 1), padding=((1, 1), (1, 1)),
        dimension_numbers=("NCHW", "OIHW", "NCHW"))
    y = y + bias.reshape(1, 1, 1, 1)
    return jax.nn.sigmoid(y)


if __name__ == "__main__":
    # Small shapes: W = 128 keeps the lane dimension dense.
    N, C, H, W = 2, 8, 16, 128

    key = jax.random.PRNGKey(0)
    kx, kw, kb = jax.random.split(key, 3)
    x = jax.random.normal(kx, (N, C, H, W), jnp.float32)
    weight = 0.1 * jax.random.normal(kw, (1, 2, 3, 3), jnp.float32)   # torch (O,I,kh,kw)
    bias = 0.1 * jax.random.normal(kb, (1,), jnp.float32)

    fwd = jax.jit(spatial_attention)
    out = jax.block_until_ready(fwd(x, weight, bias))
    assert out.shape == (N, 1, H, W) and out.dtype == jnp.float32

    ref = jax.block_until_ready(spatial_attention_ref(x, weight, bias))
    max_err = float(jnp.max(jnp.abs(out - ref)))
    assert max_err < 1e-4, f"mismatch vs reference: {max_err}"

    print("KERNEL_OK")
</pallas_src>

<mosaic_0001>
module attributes {stable_mosaic.version = 11 : i64} {
  func.func @_spatial_attention_kernel(%arg0: i32, %arg1: memref<1x8x16x128xf32, #tpu.memory_space<vmem>>, %arg2: memref<18xf32, #tpu.memory_space<smem>>, %arg3: memref<1xf32, #tpu.memory_space<smem>>, %arg4: memref<1x1x16x128xf32, #tpu.memory_space<vmem>>, %arg5: memref<2x18x130xf32, #tpu.memory_space<vmem>>) attributes {dimension_semantics = [#tpu.dimension_semantics<parallel>], iteration_bounds = array<i64: 2>, scalar_prefetch = 0 : i64, scratch_operands = 1 : i64, tpu.core_type = #tpu.core_type<tc>, window_params = [{transform_indices = @transform_0, window_bounds = array<i64: 1, 8, 16, 128>}, {transform_indices = @transform_1, window_bounds = array<i64: 18>}, {transform_indices = @transform_2, window_bounds = array<i64: 1>}, {transform_indices = @transform_3, window_bounds = array<i64: 1, 1, 16, 128>}]} {
    %c0 = arith.constant 0 : index
    %c0_0 = arith.constant 0 : index
    %c0_1 = arith.constant 0 : index
    %c0_2 = arith.constant 0 : index
    %0 = vector.load %arg1[%c0, %c0_0, %c0_1, %c0_2] : memref<1x8x16x128xf32, #tpu.memory_space<vmem>>, vector<1x8x16x128xf32>
    %1 = vector.shape_cast %0 : vector<1x8x16x128xf32> to vector<8x16x128xf32>
    %cst = arith.constant dense<0.000000e+00> : vector<16x128xf32>
    %2 = vector.multi_reduction <add>, %1, %cst [0] : vector<8x16x128xf32> to vector<16x128xf32>
    %cst_3 = arith.constant 8.000000e+00 : f32
    %3 = vector.broadcast %cst_3 : f32 to vector<16x128xf32>
    %4 = arith.divf %2, %3 : vector<16x128xf32>
    %cst_4 = arith.constant dense<0xFF800000> : vector<16x128xf32>
    %5 = vector.multi_reduction <maximumf>, %1, %cst_4 [0] : vector<8x16x128xf32> to vector<16x128xf32>
    %cst_5 = arith.constant 0.000000e+00 : f32
    %6 = vector.broadcast %cst_5 : f32 to vector<2x18x130xf32>
    %c0_6 = arith.constant 0 : index
    %c0_7 = arith.constant 0 : index
    %c0_8 = arith.constant 0 : index
    %7 = vector.load %arg5[%c0_6, %c0_7, %c0_8] : memref<2x18x130xf32, #tpu.memory_space<vmem>>, vector<2x18x130xf32>
    tpu.vector_store %arg5[%c0_6, %c0_7, %c0_8], %6 {strides = array<i32>} : memref<2x18x130xf32, #tpu.memory_space<vmem>>, vector<2x18x130xf32>,
    %c0_9 = arith.constant 0 : index
    %c1 = arith.constant 1 : index
    %c1_10 = arith.constant 1 : index
    %8 = vector.load %arg5[%c0_9, %c1, %c1_10] : memref<2x18x130xf32, #tpu.memory_space<vmem>>, vector<1x16x128xf32>
    %9 = vector.shape_cast %8 : vector<1x16x128xf32> to vector<16x128xf32>
    %10 = vector.shape_cast %4 : vector<16x128xf32> to vector<1x16x128xf32>
    tpu.vector_store %arg5[%c0_9, %c1, %c1_10], %10 {strides = array<i32>} : memref<2x18x130xf32, #tpu.memory_space<vmem>>, vector<1x16x128xf32>,
    %c1_11 = arith.constant 1 : index
    %c1_12 = arith.constant 1 : index
    %c1_13 = arith.constant 1 : index
    %11 = vector.load %arg5[%c1_11, %c1_12, %c1_13] : memref<2x18x130xf32, #tpu.memory_space<vmem>>, vector<1x16x128xf32>
    %12 = vector.shape_cast %11 : vector<1x16x128xf32> to vector<16x128xf32>
    %13 = vector.shape_cast %5 : vector<16x128xf32> to vector<1x16x128xf32>
    tpu.vector_store %arg5[%c1_11, %c1_12, %c1_13], %13 {strides = array<i32>} : memref<2x18x130xf32, #tpu.memory_space<vmem>>, vector<1x16x128xf32>,
    %cst_14 = arith.constant 0.000000e+00 : f32
    %14 = vector.broadcast %cst_14 : f32 to vector<16x128xf32>
    %c0_15 = arith.constant 0 : index
    %15 = memref.load %arg3[%c0_15] : memref<1xf32, #tpu.memory_space<smem>>
    %16 = vector.broadcast %15 : f32 to vector<16x128xf32>
    %17 = arith.addf %14, %16 : vector<16x128xf32>
    %c0_16 = arith.constant 0 : index
    %18 = memref.load %arg2[%c0_16] : memref<18xf32, #tpu.memory_space<smem>>
    %c0_17 = arith.constant 0 : index
    %c0_18 = arith.constant 0 : index
    %c0_19 = arith.constant 0 : index
    %19 = vector.load %arg5[%c0_17, %c0_18, %c0_19] : memref<2x18x130xf32, #tpu.memory_space<vmem>>, vector<1x16x128xf32>
    %20 = vector.shape_cast %19 : vector<1x16x128xf32> to vector<16x128xf32>
    %21 = vector.broadcast %18 : f32 to vector<16x128xf32>
    %22 = arith.mulf %21, %20 : vector<16x128xf32>
    %23 = arith.addf %17, %22 : vector<16x128xf32>
    %c1_20 = arith.constant 1 : index
    %24 = memref.load %arg2[%c1_20] : memref<18xf32, #tpu.memory_space<smem>>
    %c0_21 = arith.constant 0 : index
    %c0_22 = arith.constant 0 : index
    %c1_23 = arith.constant 1 : index
    %25 = vector.load %arg5[%c0_21, %c0_22, %c1_23] : memref<2x18x130xf32, #tpu.memory_space<vmem>>, vector<1x16x128xf32>
    %26 = vector.shape_cast %25 : vector<1x16x128xf32> to vector<16x128xf32>
    %27 = vector.broadcast %24 : f32 to vector<16x128xf32>
    %28 = arith.mulf %27, %26 : vector<16x128xf32>
    %29 = arith.addf %23, %28 : vector<16x128xf32>
    %c2 = arith.constant 2 : index
    %30 = memref.load %arg2[%c2] : memref<18xf32, #tpu.memory_space<smem>>
    %c0_24 = arith.constant 0 : index
    %c0_25 = arith.constant 0 : index
    %c2_26 = arith.constant 2 : index
    %31 = vector.load %arg5[%c0_24, %c0_25, %c2_26] : memref<2x18x130xf32, #tpu.memory_space<vmem>>, vector<1x16x128xf32>
    %32 = vector.shape_cast %31 : vector<1x16x128xf32> to vector<16x128xf32>
    %33 = vector.broadcast %30 : f32 to vector<16x128xf32>
    %34 = arith.mulf %33, %32 : vector<16x128xf32>
    %35 = arith.addf %29, %34 : vector<16x128xf32>
    %c3 = arith.constant 3 : index
    %36 = memref.load %arg2[%c3] : memref<18xf32, #tpu.memory_space<smem>>
    %c0_27 = arith.constant 0 : index
    %c1_28 = arith.constant 1 : index
    %c0_29 = arith.constant 0 : index
    %37 = vector.load %arg5[%c0_27, %c1_28, %c0_29] : memref<2x18x130xf32, #tpu.memory_space<vmem>>, vector<1x16x128xf32>
    %38 = vector.shape_cast %37 : vector<1x16x128xf32> to vector<16x128xf32>
    %39 = vector.broadcast %36 : f32 to vector<16x128xf32>
    %40 = arith.mulf %39, %38 : vector<16x128xf32>
    %41 = arith.addf %35, %40 : vector<16x128xf32>
    %c4 = arith.constant 4 : index
    %42 = memref.load %arg2[%c4] : memref<18xf32, #tpu.memory_space<smem>>
    %c0_30 = arith.constant 0 : index
    %c1_31 = arith.constant 1 : index
    %c1_32 = arith.constant 1 : index
    %43 = vector.load %arg5[%c0_30, %c1_31, %c1_32] : memref<2x18x130xf32, #tpu.memory_space<vmem>>, vector<1x16x128xf32>
    %44 = vector.shape_cast %43 : vector<1x16x128xf32> to vector<16x128xf32>
    %45 = vector.broadcast %42 : f32 to vector<16x128xf32>
    %46 = arith.mulf %45, %44 : vector<16x128xf32>
    %47 = arith.addf %41, %46 : vector<16x128xf32>
    %c5 = arith.constant 5 : index
    %48 = memref.load %arg2[%c5] : memref<18xf32, #tpu.memory_space<smem>>
    %c0_33 = arith.constant 0 : index
    %c1_34 = arith.constant 1 : index
    %c2_35 = arith.constant 2 : index
    %49 = vector.load %arg5[%c0_33, %c1_34, %c2_35] : memref<2x18x130xf32, #tpu.memory_space<vmem>>, vector<1x16x128xf32>
    %50 = vector.shape_cast %49 : vector<1x16x128xf32> to vector<16x128xf32>
    %51 = vector.broadcast %48 : f32 to vector<16x128xf32>
    %52 = arith.mulf %51, %50 : vector<16x128xf32>
    %53 = arith.addf %47, %52 : vector<16x128xf32>
    %c6 = arith.constant 6 : index
    %54 = memref.load %arg2[%c6] : memref<18xf32, #tpu.memory_space<smem>>
    %c0_36 = arith.constant 0 : index
    %c2_37 = arith.constant 2 : index
    %c0_38 = arith.constant 0 : index
    %55 = vector.load %arg5[%c0_36, %c2_37, %c0_38] : memref<2x18x130xf32, #tpu.memory_space<vmem>>, vector<1x16x128xf32>
    %56 = vector.shape_cast %55 : vector<1x16x128xf32> to vector<16x128xf32>
    %57 = vector.broadcast %54 : f32 to vector<16x128xf32>
    %58 = arith.mulf %57, %56 : vector<16x128xf32>
    %59 = arith.addf %53, %58 : vector<16x128xf32>
    %c7 = arith.constant 7 : index
    %60 = memref.load %arg2[%c7] : memref<18xf32, #tpu.memory_space<smem>>
    %c0_39 = arith.constant 0 : index
    %c2_40 = arith.constant 2 : index
    %c1_41 = arith.constant 1 : index
    %61 = vector.load %arg5[%c0_39, %c2_40, %c1_41] : memref<2x18x130xf32, #tpu.memory_space<vmem>>, vector<1x16x128xf32>
    %62 = vector.shape_cast %61 : vector<1x16x128xf32> to vector<16x128xf32>
    %63 = vector.broadcast %60 : f32 to vector<16x128xf32>
    %64 = arith.mulf %63, %62 : vector<16x128xf32>
    %65 = arith.addf %59, %64 : vector<16x128xf32>
    %c8 = arith.constant 8 : index
    %66 = memref.load %arg2[%c8] : memref<18xf32, #tpu.memory_space<smem>>
    %c0_42 = arith.constant 0 : index
    %c2_43 = arith.constant 2 : index
    %c2_44 = arith.constant 2 : index
    %67 = vector.load %arg5[%c0_42, %c2_43, %c2_44] : memref<2x18x130xf32, #tpu.memory_space<vmem>>, vector<1x16x128xf32>
    %68 = vector.shape_cast %67 : vector<1x16x128xf32> to vector<16x128xf32>
    %69 = vector.broadcast %66 : f32 to vector<16x128xf32>
    %70 = arith.mulf %69, %68 : vector<16x128xf32>
    %71 = arith.addf %65, %70 : vector<16x128xf32>
    %c9 = arith.constant 9 : index
    %72 = memref.load %arg2[%c9] : memref<18xf32, #tpu.memory_space<smem>>
    %c1_45 = arith.constant 1 : index
    %c0_46 = arith.constant 0 : index
    %c0_47 = arith.constant 0 : index
    %73 = vector.load %arg5[%c1_45, %c0_46, %c0_47] : memref<2x18x130xf32, #tpu.memory_space<vmem>>, vector<1x16x128xf32>
    %74 = vector.shape_cast %73 : vector<1x16x128xf32> to vector<16x128xf32>
    %75 = vector.broadcast %72 : f32 to vector<16x128xf32>
    %76 = arith.mulf %75, %74 : vector<16x128xf32>
    %77 = arith.addf %71, %76 : vector<16x128xf32>
    %c10 = arith.constant 10 : index
    %78 = memref.load %arg2[%c10] : memref<18xf32, #tpu.memory_space<smem>>
    %c1_48 = arith.constant 1 : index
    %c0_49 = arith.constant 0 : index
    %c1_50 = arith.constant 1 : index
    %79 = vector.load %arg5[%c1_48, %c0_49, %c1_50] : memref<2x18x130xf32, #tpu.memory_space<vmem>>, vector<1x16x128xf32>
    %80 = vector.shape_cast %79 : vector<1x16x128xf32> to vector<16x128xf32>
    %81 = vector.broadcast %78 : f32 to vector<16x128xf32>
    %82 = arith.mulf %81, %80 : vector<16x128xf32>
    %83 = arith.addf %77, %82 : vector<16x128xf32>
    %c11 = arith.constant 11 : index
    %84 = memref.load %arg2[%c11] : memref<18xf32, #tpu.memory_space<smem>>
    %c1_51 = arith.constant 1 : index
    %c0_52 = arith.constant 0 : index
    %c2_53 = arith.constant 2 : index
    %85 = vector.load %arg5[%c1_51, %c0_52, %c2_53] : memref<2x18x130xf32, #tpu.memory_space<vmem>>, vector<1x16x128xf32>
    %86 = vector.shape_cast %85 : vector<1x16x128xf32> to vector<16x128xf32>
    %87 = vector.broadcast %84 : f32 to vector<16x128xf32>
    %88 = arith.mulf %87, %86 : vector<16x128xf32>
    %89 = arith.addf %83, %88 : vector<16x128xf32>
    %c12 = arith.constant 12 : index
    %90 = memref.load %arg2[%c12] : memref<18xf32, #tpu.memory_space<smem>>
    %c1_54 = arith.constant 1 : index
    %c1_55 = arith.constant 1 : index
    %c0_56 = arith.constant 0 : index
    %91 = vector.load %arg5[%c1_54, %c1_55, %c0_56] : memref<2x18x130xf32, #tpu.memory_space<vmem>>, vector<1x16x128xf32>
    %92 = vector.shape_cast %91 : vector<1x16x128xf32> to vector<16x128xf32>
    %93 = vector.broadcast %90 : f32 to vector<16x128xf32>
    %94 = arith.mulf %93, %92 : vector<16x128xf32>
    %95 = arith.addf %89, %94 : vector<16x128xf32>
    %c13 = arith.constant 13 : index
    %96 = memref.load %arg2[%c13] : memref<18xf32, #tpu.memory_space<smem>>
    %c1_57 = arith.constant 1 : index
    %c1_58 = arith.constant 1 : index
    %c1_59 = arith.constant 1 : index
    %97 = vector.load %arg5[%c1_57, %c1_58, %c1_59] : memref<2x18x130xf32, #tpu.memory_space<vmem>>, vector<1x16x128xf32>
    %98 = vector.shape_cast %97 : vector<1x16x128xf32> to vector<16x128xf32>
    %99 = vector.broadcast %96 : f32 to vector<16x128xf32>
    %100 = arith.mulf %99, %98 : vector<16x128xf32>
    %101 = arith.addf %95, %100 : vector<16x128xf32>
    %c14 = arith.constant 14 : index
    %102 = memref.load %arg2[%c14] : memref<18xf32, #tpu.memory_space<smem>>
    %c1_60 = arith.constant 1 : index
    %c1_61 = arith.constant 1 : index
    %c2_62 = arith.constant 2 : index
    %103 = vector.load %arg5[%c1_60, %c1_61, %c2_62] : memref<2x18x130xf32, #tpu.memory_space<vmem>>, vector<1x16x128xf32>
    %104 = vector.shape_cast %103 : vector<1x16x128xf32> to vector<16x128xf32>
    %105 = vector.broadcast %102 : f32 to vector<16x128xf32>
    %106 = arith.mulf %105, %104 : vector<16x128xf32>
    %107 = arith.addf %101, %106 : vector<16x128xf32>
    %c15 = arith.constant 15 : index
    %108 = memref.load %arg2[%c15] : memref<18xf32, #tpu.memory_space<smem>>
    %c1_63 = arith.constant 1 : index
    %c2_64 = arith.constant 2 : index
    %c0_65 = arith.constant 0 : index
    %109 = vector.load %arg5[%c1_63, %c2_64, %c0_65] : memref<2x18x130xf32, #tpu.memory_space<vmem>>, vector<1x16x128xf32>
    %110 = vector.shape_cast %109 : vector<1x16x128xf32> to vector<16x128xf32>
    %111 = vector.broadcast %108 : f32 to vector<16x128xf32>
    %112 = arith.mulf %111, %110 : vector<16x128xf32>
    %113 = arith.addf %107, %112 : vector<16x128xf32>
    %c16 = arith.constant 16 : index
    %114 = memref.load %arg2[%c16] : memref<18xf32, #tpu.memory_space<smem>>
    %c1_66 = arith.constant 1 : index
    %c2_67 = arith.constant 2 : index
    %c1_68 = arith.constant 1 : index
    %115 = vector.load %arg5[%c1_66, %c2_67, %c1_68] : memref<2x18x130xf32, #tpu.memory_space<vmem>>, vector<1x16x128xf32>
    %116 = vector.shape_cast %115 : vector<1x16x128xf32> to vector<16x128xf32>
    %117 = vector.broadcast %114 : f32 to vector<16x128xf32>
    %118 = arith.mulf %117, %116 : vector<16x128xf32>
    %119 = arith.addf %113, %118 : vector<16x128xf32>
    %c17 = arith.constant 17 : index
    %120 = memref.load %arg2[%c17] : memref<18xf32, #tpu.memory_space<smem>>
    %c1_69 = arith.constant 1 : index
    %c2_70 = arith.constant 2 : index
    %c2_71 = arith.constant 2 : index
    %121 = vector.load %arg5[%c1_69, %c2_70, %c2_71] : memref<2x18x130xf32, #tpu.memory_space<vmem>>, vector<1x16x128xf32>
    %122 = vector.shape_cast %121 : vector<1x16x128xf32> to vector<16x128xf32>
    %123 = vector.broadcast %120 : f32 to vector<16x128xf32>
    %124 = arith.mulf %123, %122 : vector<16x128xf32>
    %125 = arith.addf %119, %124 : vector<16x128xf32>
    %126 = arith.negf %125 : vector<16x128xf32>
    %127 = math.exp %126 : vector<16x128xf32>
    %cst_72 = arith.constant 1.000000e+00 : f32
    %128 = vector.broadcast %cst_72 : f32 to vector<16x128xf32>
    %129 = arith.addf %128, %127 : vector<16x128xf32>
    %130 = arith.divf %128, %129 : vector<16x128xf32>
    %c0_73 = arith.constant 0 : index
    %c0_74 = arith.constant 0 : index
    %c0_75 = arith.constant 0 : index
    %c0_76 = arith.constant 0 : index
    %131 = vector.load %arg4[%c0_73, %c0_74, %c0_75, %c0_76] : memref<1x1x16x128xf32, #tpu.memory_space<vmem>>, vector<1x1x16x128xf32>
    %132 = vector.shape_cast %131 : vector<1x1x16x128xf32> to vector<16x128xf32>
    %133 = vector.shape_cast %130 : vector<16x128xf32> to vector<1x1x16x128xf32>
    tpu.vector_store %arg4[%c0_73, %c0_74, %c0_75, %c0_76], %133 {strides = array<i32>} : memref<1x1x16x128xf32, #tpu.memory_space<vmem>>, vector<1x1x16x128xf32>,
    return
  }
  func.func @transform_0(%arg0: i32) -> (i32, i32, i32, i32) {
    %c0_i32 = arith.constant 0 : i32
    %c0_i32_0 = arith.constant 0 : i32
    %c0_i32_1 = arith.constant 0 : i32
    %c0_i32_2 = arith.constant 0 : i32
    return %arg0, %c0_i32, %c0_i32_0, %c0_i32_1 : i32, i32, i32, i32
  }
  func.func @transform_1(%arg0: i32) -> i32 {
    %c0_i32 = arith.constant 0 : i32
    %c0_i32_0 = arith.constant 0 : i32
    return %c0_i32 : i32
  }
  func.func @transform_2(%arg0: i32) -> i32 {
    %c0_i32 = arith.constant 0 : i32
    %c0_i32_0 = arith.constant 0 : i32
    return %c0_i32 : i32
  }
  func.func @transform_3(%arg0: i32) -> (i32, i32, i32, i32) {
    %c0_i32 = arith.constant 0 : i32
    %c0_i32_0 = arith.constant 0 : i32
    %c0_i32_1 = arith.constant 0 : i32
    %c0_i32_2 = arith.constant 0 : i32
    return %arg0, %c0_i32, %c0_i32_0, %c0_i32_1 : i32, i32, i32, i32
  }
}

</mosaic_0001>

<bundles_post_ra>
// kernel: spatial_attention.1
= control target key start
LH: loop header
LB: loop body
LE: loop exit
PB: predicated region body
PF: predicated region fallthrough
CT: control target
= control target key end

     0   :  { %s1667_s0 = inlined_call_operand.hbm [shape: f32[2,8,16,128], index: 0, kind: input, shape index: {}]   ;;  %s1668_s1 = inlined_call_operand.vmem [shape: f32[18], index: 1, kind: input, shape index: {}]   ;;  %s1669_s2 = inlined_call_operand.<no memory space> [shape: f32[1], index: 2, kind: input, shape index: {}]   ;;  %s1670_s3 = inlined_call_operand.hbm [shape: f32[2,1,16,128], index: 3, kind: output, shape index: {}]  }
   0x1   :  { %8 = sst [smem:[#allocation3]] %s1669_s2 }
   0x2   :  { %9 = vsyncpa [#allocation5], 0 }
   0x3   :  { %11 = vsyncpa [#allocation5 + $0x1], 0 }
   0x4   :  { %12 = vsyncpa [#allocation7], 0 }
   0x5   :  { %13 = vsyncpa [#allocation6], 0 }
   0x6   :  { %15 = vsyncpa [#allocation6 + $0x1], 0  ;;  %s1212_s14 = smov 0   ;;  %s1214_s15 = smov 0  }
   0x7   :  { %s1216_s16 = smov 0   ;;  %s1218_s17 = smov 0  }
   0x8 LB: > { %s1233_s2 = sadd.s32 4294967295, %s1176_s17   ;;  %s955_s18 = sadd.s32 4294967294, %s1176_s17   ;;  %s1176_s17 = sphi %s1218_s17, %s1692_s17   ;;  %s1172_s16 = sphi %s1216_s16, %s1691_s16   ;;  %s1168_s15 = sphi %s1214_s15, %s1690_s15   ;;  %s1164_s14 = sphi %s1212_s14, %s1689_s14  }
   0x9   : > { %s1237_s19 = sadd.s32 1, %s1176_s17   ;;  %s28_s20 = sadd.s32 1, %s1172_s16 }
   0xa   : > { %s25_s21 = ssub.s32 %s1176_s17, %s1237_s19  ;;  %p35_p0 = scmp.ne.s32.totalorder %s1172_s16, %s1168_s15 }
   0xb   : > { %p26_p1 = scmp.eq.s32.totalorder %s25_s21, 0  ;;  %p36_p2 = scmp.eq.s32.totalorder %s1176_s17, 0 }
   0xc   : > { %p41_p3 = scmp.ne.s32.totalorder %s1168_s15, %s1164_s14  ;;  %p1672_p4 = scmp.eq.s32.totalorder %s1233_s2, 0 }
   0xd   : > { %s1249_s22 = scalar_select %p26_p1, %s1172_s16, %s28_s20  }
   0xe   : > { %p1251_p5 = por %p36_p2, %p35_p0  ;;  %p1257_p6 = por %p1672_p4, %p41_p3 }
   0xf   : > { %p107_p7 = scmp.eq.s32.totalorder %s1233_s2, 1  ;;  %p113_p8 = scmp.eq.s32.totalorder %s955_s18, 1 }
  0x10   : > { %s1676_s24 = scalar_select %p1257_p6, 1, 0 }
  0x11   : > { %p956_p9 = scmp.ge.s32.totalorder %s1176_s17, 1  ;;  %p120_p10 = scmp.lt.s32.totalorder %s1176_s17, 3 }
  0x12   : > { %p1264_p11 = por %p107_p7, %p35_p0  ;;  %p1268_p12 = por %p113_p8, %p41_p3 }
  0x13   : > { %p1272_p13 = pnand %p956_p9, %p120_p10  ;;  %s133_s30 = sshll.u32 %s1668_s1, 4  ;;  %s134_s30 = int_to_ptr.vmem [resolvable:$true] %s133_s30 }
  0x14   : > { %s1677_s25 = scalar_select %p1264_p11, 1, 0 }
  0x15   : > { %s1678_s26 = scalar_select %p1268_p12, 1, 0 }
  0x16   : > { %s1679_s27 = scalar_select %p1272_p13, 1, 0 }
  0x17   : > { %p1000_p1 = pneg %p1272_p13  ;;  %p1013_p2 = scmp.lt.s32.totalorder %s1176_s17, 2 }
  0x18   : > { %s147_s5 = sand.u32 1, %s1172_s16   ;;  %s1065_s8 = scalar_lea.vmem %s134_s30, 16 }
  0x19   : > { %p1285_p7 = pnand %p1000_p1, %p1672_p4  ;;  %p1292_p3 = pnand %p1013_p2, %p1251_p5 }
  0x1a   : > { %s959_s7 = sshll.u32 %s147_s5, 7  ;;  %p1066_p8 = scmp.ne.s32.totalorder %s134_s30, %s1065_s8 }
  0x1b   : > { %p1067_p9 = pneg %p1285_p7  ;;  %p1073_p12 = scmp.lt.s32.totalorder %s134_s30, %s134_s30 }
  0x1c   : > { %p1074_p11 = scmp.lt.s32.totalorder %s1065_s8, %s1065_s8 }
  0x1d   : > { %p1068_p10 = pnand %p1067_p9, %p1066_p8 }
  0x1e   : > { %p1075_p1 = por %p1074_p11, %p1073_p12 }
  0x1f   : > { %p1069_p0 = pneg %p1068_p10 }
  0x21   : > { %p1076_p4 = pnand %p1075_p1, %p1069_p0 }
  0x23   : > { %1079 = shalt.err (!%p1076_p4)
}
  0x24   : > { %s1178_s9 = smov [#allocation8]   ;;  %s990_s10 = sshll.u32 %s1176_s17, 11 }
  0x25   : > { %1003 = dma.vmem_to_smem (!%p1285_p7), %s134_s30, 16, %s1178_s9, [#allocation7]  }
  0x26   : > { %s151_s11 = scalar_lea.vmem [#allocation4], %s959_s7  ;;  %s1304_s20 = scalar_lea.hbm %s1667_s0, %s990_s10 }
  0x27   : > { %s158_s12 = sshll.u32 %s151_s11, 4  ;;  %s1308_s21 = scalar_lea.sflag [#allocation5], %s147_s5  ;;  %s1306_s12 = int_to_ptr.vmem [resolvable:$true] %s158_s12 }
  0x28   : > { %s1080_s23 = scalar_lea.hbm %s1304_s20, 2048  ;;  %p1082_p5 = pneg %p1292_p3 }
  0x29   : > { %p1081_p4 = scmp.ne.s32.totalorder %s1304_s20, %s1080_s23  ;;  %s1085_s30 = scalar_lea.hbm %s1667_s0, 4096 }
  0x2a   : > { %p1086_p0 = scmp.lt.s32.totalorder %s1304_s20, %s1667_s0  ;;  %p1087_p2 = scmp.lt.s32.totalorder %s1085_s30, %s1080_s23 }
  0x2b   : > { %p1083_p11 = pnand %p1082_p5, %p1081_p4 }
  0x2c   : > { %p1088_p7 = por %p1087_p2, %p1086_p0 }
  0x2d   : > { %p1084_p12 = pneg %p1083_p11 }
  0x2f   : > { %p1089_p8 = pnand %p1088_p7, %p1084_p12 }
  0x31   : > { %1092 = shalt.err (!%p1089_p8)
}
  0x32   : > { %s1093_s5 = scalar_lea.vmem %s1306_s12, 2048  ;;  %s1179_s8 = smov [#allocation4]  }
  0x33   : > { %p1094_p9 = scmp.ne.s32.totalorder %s1306_s12, %s1093_s5  ;;  %s1098_s9 = sshll.u32 %s1179_s8, 4  ;;  %s1099_s9 = int_to_ptr.vmem [resolvable:$false] %s1098_s9 }
  0x34   : > { %s1100_s10 = scalar_lea.vmem %s1099_s9, 4096  ;;  %p1101_p4 = scmp.lt.s32.totalorder %s1306_s12, %s1099_s9 }
  0x35   : > { %p1096_p10 = pnand %p1094_p9, %p1082_p5  ;;  %p1102_p11 = scmp.lt.s32.totalorder %s1100_s10, %s1093_s5 }
  0x37   : > { %p1097_p1 = pneg %p1096_p10  ;;  %p1103_p6 = por %p1102_p11, %p1101_p4 }
  0x39   : > { %p1104_p13 = pnand %p1103_p6, %p1097_p1 }
  0x3b   : > { %1107 = shalt.err (!%p1104_p13)
}
  0x3c   : > { %s1180_s11 = smov 128   ;;  %s1181_s13 = smov 8  }
  0x3d   : > { %1007 = dma.hbm_to_vmem [thread:$0]  (!%p1292_p3), %s1304_s20, 2048, %s1306_s12, %s1308_s21, %s1180_s11, %s1180_s11, %s1181_s13  }
  0x3e   : > { %p1682_p5 = scmp.ne.s32.totalorder %s1679_s27, 0 }
  0x3f   : > { %s1332_s18 = sand.u32 (!%p1682_p5), 1, %s1168_s15   ;;  %p1683_p6 = scmp.ne.s32.totalorder (!%p1682_p5), %s1676_s24, 0 }
  0x40   : > { %170 = sbr.rel (%p1682_p5) target bundleno = 479 (0x1df), region = 32  ;;  %s963_s23 = sshll.u32 (!%p1682_p5), %s1332_s18, 7 }
  0x41   : > { %s173_s28 = scalar_lea.sflag (!%p1682_p5), [#allocation5], %s1332_s18  ;;  %s1336_s29 = scalar_lea.vmem (!%p1682_p5), [#allocation4], %s963_s23 }
  0x45   : > { %1151 = dma.done.wait (%p1683_p6), %s173_s28, 2048  }
  0x46   : > { %1153 = vsyncadd (%p1683_p6), %s173_s28, 4294965248  ;;  %p1684_p13 = scmp.eq.s32.totalorder %s1233_s2, 0 }
  0x48   : > { %1155 = dma.done.wait (%p1684_p13), [#allocation7], 16   ;;  %p1685_p3 = pmov %p1684_p13 }
  0x4a   : > { %1157 = vsyncadd (%p1685_p3), [#allocation7], 4294967280 }
  0x4b   : > { %185 = sfence }
  0x4c   : > { %v204_v0 = vld [vmem:[%s1336_s29] sm:$0xff]  ;;  %v206_v1 = vld [vmem:[%s1336_s29 + $0x10] sm:$0xff]  ;;  %vm252_vm0 = vcmask 15360   ;;  %v1182_v8 = vmov 0.0   ;;  %v205_v12 = vld [vmem:[%s1336_s29 + $0x8] sm:$0xff]  ;;  %vm257_vm1 = vcmask 9216  }
  0x4d   : > { %v208_v2 = vld [vmem:[%s1336_s29 + $0x20] sm:$0xff]  ;;  %v210_v3 = vld [vmem:[%s1336_s29 + $0x30] sm:$0xff]  ;;  %v220_v7 = vadd.f32 %v206_v1, %v204_v0  ;;  %259 = vst [vmem:[#allocation2 + $0x30] sm:$0xff] %v1182_v8  ;;  %251 = vst [vmem:[#allocation2] sm:$0xff] %v1182_v8  ;;  %s1183_s24 = smov 1   ;;  %vm267_vm2 = vcmask 1040384  }
  0x4e   : > { %v212_v4 = vld [vmem:[%s1336_s29 + $0x40] sm:$0xff]  ;;  %v214_v5 = vld [vmem:[%s1336_s29 + $0x50] sm:$0xff]  ;;  %v237_v6 = vmax.f32 %v204_v0, %v208_v2  ;;  %254 = vst [vmem:[#allocation2 + $0x10] sm:$0xff] %v1182_v8  ;;  %256 = vst [vmem:[#allocation2 + $0x20] sm:$0x3] %v1182_v8  ;;  %v238_v11 = vmax.f32 %v206_v1, %v210_v3  ;;  %vm280_vm3 = vcmask 1047561  }
  0x4f   : > { %261 = vst [vmem:[#allocation2 + $0x40] sm:$0xff] %v1182_v8  ;;  %263 = vst [vmem:[#allocation2 + $0x50] sm:$0x3] %v1182_v8  ;;  %v216_v9 = vld [vmem:[%s1336_s29 + $0x60] sm:$0xff]  ;;  %v218_v10 = vld [vmem:[%s1336_s29 + $0x70] sm:$0xff]  ;;  %v221_v14 = vadd.f32 %v220_v7, %v208_v2  ;;  %vm282_vm4 = vcmask 7169  }
  0x50   : > { %260 = vst.msk [vmem:[#allocation2 + $0x38] sm:$0xff] %vm252_vm0, %v1182_v8  ;;  %253 = vst.msk [vmem:[#allocation2 + $0x8] sm:$0xff] %vm252_vm0, %v1182_v8  ;;  %v239_v13 = vmax.f32 %v237_v6, %v212_v4  ;;  %v207_v15 = vld [vmem:[%s1336_s29 + $0x18] sm:$0xff]  ;;  %v209_v16 = vld [vmem:[%s1336_s29 + $0x28] sm:$0xff]  ;;  %v240_v18 = vmax.f32 %v238_v11, %v214_v5  ;;  %s975_s27 = sld [smem:[#allocation8 + $0xa]]  ;;  %vm288_vm5 = vcmask 1040392  }
  0x51   : > { %255 = vst.msk [vmem:[#allocation2 + $0x18] sm:$0xff] %vm252_vm0, %v1182_v8  ;;  %262 = vst.msk [vmem:[#allocation2 + $0x48] sm:$0xff] %vm252_vm0, %v1182_v8  ;;  %v211_v17 = vld [vmem:[%s1336_s29 + $0x38] sm:$0xff]  ;;  %v227_v19 = vadd.f32 %v207_v15, %v205_v12  ;;  %v244_v20 = vmax.f32 %v205_v12, %v209_v16  ;;  %v222_v23 = vadd.f32 %v221_v14, %v210_v3  ;;  %v213_v27 = vld [vmem:[%s1336_s29 + $0x48] sm:$0xff]  ;;  %s976_s6 = sld [smem:[#allocation8 + $0xb]]  ;;  %vm290_vm6 = vcmask 0  }
  0x52   : > { %v245_v21 = vmax.f32 %v207_v15, %v211_v17  ;;  %v241_v22 = vmax.f32 %v239_v13, %v216_v9  ;;  %v242_v24 = vmax.f32 %v240_v18, %v218_v10  ;;  %v215_v28 = vld [vmem:[%s1336_s29 + $0x58] sm:$0xff]  ;;  %258 = vst.msk [vmem:[#allocation2 + $0x28] sm:$0x3] %vm257_vm1, %v1182_v8  ;;  %264 = vst.msk [vmem:[#allocation2 + $0x58] sm:$0x3] %vm257_vm1, %v1182_v8  ;;  %v217_v37 = vld [vmem:[%s1336_s29 + $0x68] sm:$0xff] }
  0x53   : > { %v228_v25 = vadd.f32 %v227_v19, %v209_v16  ;;  %v223_v26 = vadd.f32 %v222_v23, %v212_v4  ;;  %v246_v31 = vmax.f32 %v244_v20, %v213_v27  ;;  %v219_v38 = vld [vmem:[%s1336_s29 + $0x78] sm:$0xff]  ;;  %vm284_vm7 = vcmask 1047560   ;;  %s1184_s12 = smov 127   ;;  %s1185_s20 = smov 126  }
  0x54   : > { %v243_v29 = vmax.f32 %v241_v22, %v242_v24  ;;  %v247_v32 = vmax.f32 %v245_v21, %v215_v28  ;;  %vm286_vm8 = vcmask 7168   ;;  %s978_s21 = sld [smem:[#allocation8 + $0xd]]  ;;  %vm389_vm9 = vcmask 1046528   ;;  %p1686_p0 = scmp.ne.s32.totalorder %s1677_s25, 0 }
  0x55   : > { %v229_v30 = vadd.f32 %v228_v25, %v211_v17  ;;  %v224_v33 = vadd.f32 %v223_v26, %v214_v5  ;;  %v248_v40 = vmax.f32 %v246_v31, %v217_v37  ;;  %s979_s30 = sld [smem:[#allocation8 + $0xe]]  ;;  %vm491_vm10 = vcmask 1045504  }
  0x56   : > { %v294_v34 = vrot.slane %v243_v29, 7  ;;  %v249_v41 = vmax.f32 %v247_v32, %v219_v38  ;;  %v594_v54 = vstv %s975_s27  ;;  %s966_s4 = sld [smem:[#allocation8 + $0x1]]  ;;  %vm346_vm11 = vcmask 1039360  }
  0x57   : > { %v230_v35 = vadd.f32 %v229_v30, %v213_v27  ;;  %v225_v36 = vadd.f32 %v224_v33, %v216_v9  ;;  %v618_v58 = vstv %s976_s6  ;;  %s1410_s7 = sld [smem:[#allocation8 + $0x2]]  ;;  %vm371_vm12 = vcmask 1031168  }
  0x58   : > { %297 = vrot.lane.b32.xlu1 %v294_v34, %s1183_s24  ;;  %v250_v46 = vmax.f32 %v248_v40, %v249_v41  ;;  %s968_s5 = sld [smem:[#allocation8 + $0x3]] }
  0x59   : > { %v231_v39 = vadd.f32 %v230_v35, %v215_v28  ;;  %v226_v42 = vadd.f32 %v225_v36, %v218_v10  ;;  %s977_s8 = sld [smem:[#allocation8 + $0xc]] }
  0x5a   : > { %v295_v50 = vrot.slane %v250_v46, 7  ;;  %v668_v8 = vstv %s978_s21  ;;  %s980_s9 = sld [smem:[#allocation8 + $0xf]]  ;;  %s991_s21 = sshll.u32 %s1233_s2, 8 }
  0x5b   : > { %v232_v43 = vadd.f32 %v231_v39, %v217_v37  ;;  %v235_v44 = vmul.f32 0.125, %v226_v42  ;;  %v1398_v26 = vstv %s979_s30  ;;  %s969_s10 = sld [smem:[#allocation8 + $0x4]]  ;;  %s1186_s2 = smov [#allocation9]  }
  0x5c   : > { %v296_v52 = vsel %vm267_vm2, %v294_v34, %v295_v50  ;;  %s971_s11 = sld [smem:[#allocation8 + $0x6]]  ;;  %v329_v42 = vstv %s966_s4 }
  0x5d   : > { %v233_v45 = vadd.f32 %v232_v43, %v219_v38  ;;  %v268_v47 = vrot.slane %v235_v44, 7  ;;  %s1450_s13 = sld [smem:[#allocation8 + $0x5]] }
  0x5e   : > { %s972_s23 = sld [smem:[#allocation8 + $0x7]] }
  0x5f   : > { %v236_v48 = vmul.f32 0.125, %v233_v45  ;;  %271 = vrot.lane.b32.xlu0 %v268_v47, %s1183_s24  ;;  %v382_v45 = vstv %s968_s5  ;;  %v645_v46 = vstv %s977_s8  ;;  %s973_s28 = sld [smem:[#allocation8 + $0x8]]  ;;  %s1622_s8 = scalar_lea.hbm %s1670_s3, %s991_s21 }
  0x60   : > { %s981_s29 = sld [smem:[#allocation8 + $0x10]] }
  0x61   : > { %v269_v49 = vrot.slane %v236_v48, 7  ;;  %s316_s27 = sld [smem:[#allocation8]] }
  0x62   : > { %s313_s6 = sld [smem:[#allocation3]] }
  0x63   : > { %275 = vrot.lane.b32.xlu1 %v269_v49, %s1183_s24  ;;  %v270_v51 = vsel %vm267_vm2, %v268_v47, %v269_v49 }
  0x64   : > { %273 = vrot.lane.b32.xlu0 %v270_v51, %s1183_s24 }
  0x67   : > { %301 = vrot.lane.b32.xlu1 %v295_v50, %s1183_s24  ;;  %v354_v50 = vstv %s1410_s7 }
  0x68   : > { %299 = vrot.lane.b32.xlu0 %v296_v52, %s1183_s24  ;;  %s982_s24 = sld [smem:[#allocation8 + $0x11]] }
  0xca   : > { %v298_v53 = vpop.permute.xlu1 %297 }
  0xcb   : > { %307 = vst.msk [vmem:[#allocation2 + $0x30] sm:$0xfe] %vm280_vm3, %v298_v53 }
  0xcc   : > { %308 = vst.msk [vmem:[#allocation2 + $0x38] sm:$0xfe] %vm282_vm4, %v298_v53  ;;  %v746_v53 = vstv %s980_s9  ;;  %s857_s9 = scalar_lea.sflag [#allocation6], %s1332_s18 }
  0xd1   : > { %v272_v55 = vpop.permute.xlu0 %271 }
  0xd2   : > { %281 = vst.msk [vmem:[#allocation2] sm:$0xfe] %vm280_vm3, %v272_v55  ;;  %v1362_v57 = vld [vmem:[#allocation2 + $0x30] sm:$0xff] }
  0xd3   : > { %283 = vst.msk [vmem:[#allocation2 + $0x8] sm:$0xfe] %vm282_vm4, %v272_v55  ;;  %v591_v56 = vld [vmem:[#allocation2 + $0x38] sm:$0xff]  ;;  %v595_v60 = vmul.f32 %v594_v54, %v1362_v57  ;;  %v619_v0 = vmul.f32 %v618_v58, %v1362_v57  ;;  %v662_v9 = vld [vmem:[#allocation2 + $0x30] sm:$0xfe]  ;;  %v406_v55 = vstv %s969_s10 }
  0xd4   : > { %v596_v59 = vmul.f32 %v594_v54, %v591_v56  ;;  %v620_v63 = vmul.f32 %v618_v58, %v591_v56  ;;  %v663_v7 = vld [vmem:[#allocation2 + $0x38] sm:$0xfe]  ;;  %v669_v15 = vmul.f32 %v668_v8, %v662_v9  ;;  %v707_v32 = vmul.f32 %v1398_v26, %v662_v9  ;;  %v642_v47 = vld [vmem:[#allocation2 + $0x30] sm:$0xfe] }
  0xd5   : > { %v276_v61 = vpop.permute.xlu1 %275  ;;  %603 = vrot.lane.b32.xlu0 %v595_v60, %s1184_s12  ;;  %v670_v14 = vmul.f32 %v668_v8, %v663_v7  ;;  %v708_v31 = vmul.f32 %v1398_v26, %v663_v7  ;;  %v744_v52 = vld [vmem:[#allocation2 + $0x30] sm:$0xfc]  ;;  %v484_v60 = vstv %s971_s11  ;;  %s1112_s11 = sshll.u32 %s1186_s2, 4  ;;  %s1113_s11 = int_to_ptr.vmem [resolvable:$false] %s1112_s11 }
  0xd6   : > { %289 = vst.msk [vmem:[#allocation2 + $0x20] sm:$0x1] %vm288_vm5, %v276_v61  ;;  %v274_v62 = vpop.permute.xlu0 %273  ;;  %605 = vrot.lane.b32.xlu1 %v596_v59, %s1184_s12  ;;  %v681_v23 = vrot.slane %v669_v15, 1  ;;  %v719_v38 = vrot.slane %v707_v32, 1 }
  0xd7   : > { %291 = vst.msk [vmem:[#allocation2 + $0x28] sm:$0x1] %vm290_vm6, %v276_v61  ;;  %v684_v22 = vrot.slane %v670_v14, 1  ;;  %v722_v37 = vrot.slane %v708_v31, 1 }
  0xd8   : > { %285 = vst.msk [vmem:[#allocation2 + $0x10] sm:$0xff] %vm284_vm7, %v274_v62 }
  0xd9   : > { %287 = vst.msk [vmem:[#allocation2 + $0x18] sm:$0xff] %vm286_vm8, %v274_v62  ;;  %v302_v1 = vpop.permute.xlu1 %301  ;;  %627 = vrot.lane.b32.xlu0 %v619_v0, %s1185_s20  ;;  %v1428_v43 = vld [vmem:[#allocation2] sm:$0xff]  ;;  %v646_v62 = vmul.f32 %v645_v46, %v642_v47 }
  0xda   : > { %311 = vst.msk [vmem:[#allocation2 + $0x50] sm:$0x1] %vm288_vm5, %v302_v1  ;;  %v300_v2 = vpop.permute.xlu0 %299  ;;  %629 = vrot.lane.b32.xlu1 %v620_v63, %s1185_s20  ;;  %v326_v41 = vld [vmem:[#allocation2 + $0x8] sm:$0xff]  ;;  %v379_v44 = vld [vmem:[#allocation2] sm:$0xfe]  ;;  %v330_v49 = vmul.f32 %v329_v42, %v1428_v43  ;;  %v355_v0 = vmul.f32 %v354_v50, %v1428_v43 }
  0xdb   : > { %312 = vst.msk [vmem:[#allocation2 + $0x58] sm:$0x1] %vm290_vm6, %v302_v1  ;;  %v331_v48 = vmul.f32 %v329_v42, %v326_v41  ;;  %v482_v59 = vld [vmem:[#allocation2] sm:$0xfc]  ;;  %v356_v63 = vmul.f32 %v354_v50, %v326_v41 }
  0xdc   : > { %309 = vst.msk [vmem:[#allocation2 + $0x40] sm:$0xff] %vm284_vm7, %v300_v2 }
  0xdd   : > { %310 = vst.msk [vmem:[#allocation2 + $0x48] sm:$0xff] %vm286_vm8, %v300_v2  ;;  %v381_v56 = vld [vmem:[#allocation2 + $0x20] sm:$0x1] }
  0xde   : > { %v483_v61 = vld [vmem:[#allocation2 + $0x20] sm:$0x3]  ;;  %v385_v9 = vmul.f32 %v382_v45, %v381_v56 }
  0xdf   : > { %v487_v15 = vmul.f32 %v484_v60, %v483_v61  ;;  %v404_v41 = vld [vmem:[#allocation2 + $0x20] sm:$0x1] }
  0xe0   : > { %v1434_v51 = vld [vmem:[#allocation2 + $0x18] sm:$0xff] }
  0xe1   : > { %v1388_v13 = vld [vmem:[#allocation2 + $0x50] sm:$0x1]  ;;  %v333_v1 = vmul.f32 %v329_v42, %v1434_v51  ;;  %v1444_v7 = vmul.f32 %v406_v55, %v1434_v51 }
  0xe2   : > { %v1386_v12 = vld [vmem:[#allocation2 + $0x58] sm:$0x1]  ;;  %v673_v19 = vmul.f32 %v668_v8, %v1388_v13  ;;  %v644_v2 = vld [vmem:[#allocation2 + $0x50] sm:$0x1] }
  0xe3   : > { %v1380_v4 = vld [vmem:[#allocation2 + $0x40] sm:$0xff]  ;;  %v674_v18 = vmul.f32 %v668_v8, %v1386_v12 }
  0xe4   : > { %v1378_v3 = vld [vmem:[#allocation2 + $0x48] sm:$0xff]  ;;  %v597_v6 = vmul.f32 %v594_v54, %v1380_v4  ;;  %v671_v11 = vmul.f32 %v668_v8, %v1380_v4  ;;  %v621_v17 = vmul.f32 %v618_v58, %v1380_v4  ;;  %v687_v25 = vrot.slane %v673_v19, 1 }
  0xe5   : > { %v598_v5 = vmul.f32 %v594_v54, %v1378_v3  ;;  %v672_v10 = vmul.f32 %v668_v8, %v1378_v3  ;;  %v622_v16 = vmul.f32 %v618_v58, %v1378_v3  ;;  %v689_v24 = vrot.slane %v674_v18, 1  ;;  %v1436_v54 = vld [vmem:[#allocation2 + $0x10] sm:$0xff] }
  0xe6   : > { %607 = vrot.lane.b32.xlu0 %v597_v6, %s1184_s12  ;;  %v682_v21 = vrot.slane %v671_v11, 1  ;;  %v1404_v29 = vmul.f32 %v1398_v26, %v1378_v3  ;;  %v1408_v30 = vmul.f32 %v1398_v26, %v1380_v4  ;;  %v383_v58 = vmul.f32 %v382_v45, %v379_v44 }
  0xe7   : > { %609 = vrot.lane.b32.xlu1 %v598_v5, %s1184_s12  ;;  %v685_v20 = vrot.slane %v672_v10, 1  ;;  %v747_v5 = vmul.f32 %v746_v53, %v744_v52  ;;  %v332_v6 = vmul.f32 %v329_v42, %v1436_v54  ;;  %v384_v8 = vmul.f32 %v382_v45, %v1436_v54 }
  0xe8   : > { %v683_v28 = vsel %vm389_vm9, %v681_v23, %v682_v21  ;;  %v688_v34 = vsel %vm389_vm9, %v682_v21, %v687_v25  ;;  %v723_v35 = vrot.slane %v1404_v29, 1  ;;  %v720_v36 = vrot.slane %v1408_v30, 1  ;;  %v401_v25 = vld [vmem:[#allocation2 + $0x8] sm:$0xfe] }
  0xe9   : > { %v686_v27 = vsel %vm389_vm9, %v684_v22, %v685_v20  ;;  %v690_v33 = vsel %vm389_vm9, %v685_v20, %v689_v24  ;;  %v390_v10 = vrot.slane %v383_v58, 1  ;;  %v485_v11 = vmul.f32 %v484_v60, %v482_v59  ;;  %v745_v24 = vld [vmem:[#allocation2 + $0x50] sm:$0x3] }
  0xea   : > { %631 = vrot.lane.b32.xlu0 %v621_v17, %s1185_s20  ;;  %v724_v39 = vsel %vm389_vm9, %v722_v37, %v723_v35  ;;  %v721_v40 = vsel %vm389_vm9, %v719_v38, %v720_v36  ;;  %v486_v14 = vmul.f32 %v484_v60, %v1436_v54  ;;  %v393_v17 = vrot.slane %v385_v9, 1  ;;  %v405_v37 = vld [vmem:[#allocation2 + $0x28] sm:$0x1] }
  0xeb   : > { %633 = vrot.lane.b32.xlu1 %v622_v16, %s1185_s20  ;;  %v391_v16 = vrot.slane %v384_v8, 1  ;;  %v647_v18 = vmul.f32 %v645_v46, %v1380_v4  ;;  %v648_v19 = vmul.f32 %v645_v46, %v644_v2  ;;  %v492_v20 = vrot.slane %v485_v11, 2 }
  0xec   : > { %v493_v21 = vrot.slane %v486_v14, 2  ;;  %v495_v22 = vrot.slane %v487_v15, 2  ;;  %v652_v23 = vrot.slane %v646_v62, 1  ;;  %v749_v45 = vmul.f32 %v746_v53, %v745_v24 }
  0xed   : > { %v1457_v31 = vsel %vm389_vm9, %v391_v16, %v393_v17  ;;  %v653_v32 = vrot.slane %v647_v18, 1  ;;  %v408_v46 = vmul.f32 %v406_v55, %v401_v25  ;;  %v358_v52 = vmul.f32 %v354_v50, %v1434_v51 }
  0xee   : > { %691 = vrot.lane.b32.xlu0 %v683_v28, %s1184_s12  ;;  %v1454_v28 = vsel %vm389_vm9, %v390_v10, %v391_v16  ;;  %v1461_v38 = vsel %vm491_vm10, %v492_v20, %v493_v21  ;;  %v357_v56 = vmul.f32 %v354_v50, %v1436_v54  ;;  %v412_v58 = vmul.f32 %v406_v55, %v405_v37 }
  0xef   : > { %693 = vrot.lane.b32.xlu1 %v686_v27, %s1184_s12  ;;  %v400_v27 = vld [vmem:[#allocation2] sm:$0xfe]  ;;  %v1473_v44 = vsel %vm389_vm9, %v652_v23, %v653_v32  ;;  %v756_v59 = vrot.slane %v749_v45, 2  ;;  %v423_v60 = vrot.slane %v1444_v7, 1  ;;  %v411_v62 = vmul.f32 %v406_v55, %v404_v41  ;;  %v503_v23 = vld [vmem:[#allocation2 + $0x8] sm:$0xfc] }
  0xf0   : > { %v407_v47 = vmul.f32 %v406_v55, %v400_v27  ;;  %v444_v2 = vstv %s1450_s13  ;;  %v427_v50 = vrot.slane %v412_v58, 1  ;;  %s1114_s13 = scalar_lea.vmem %s1113_s11, 512 }
  0xf1   : > { %v425_v7 = vrot.slane %v411_v62, 1  ;;  %v447_v8 = vmul.f32 %v444_v2, %v1436_v54  ;;  %v446_v9 = vmul.f32 %v444_v2, %v401_v25  ;;  %v445_v10 = vmul.f32 %v444_v2, %v400_v27  ;;  %v502_v25 = vld [vmem:[#allocation2] sm:$0xfc] }
  0xf2   : > { %695 = vrot.lane.b32.xlu0 %v688_v34, %s1184_s12  ;;  %v409_v34 = vmul.f32 %v406_v55, %v1436_v54  ;;  %v428_v11 = vsel %vm389_vm9, %v423_v60, %v427_v50  ;;  %v450_v17 = vmul.f32 %v444_v2, %v405_v37  ;;  %v449_v18 = vmul.f32 %v444_v2, %v404_v41  ;;  %v505_v37 = vld [vmem:[#allocation2 + $0x28] sm:$0x3] }
  0xf3   : > { %697 = vrot.lane.b32.xlu1 %v690_v33, %s1184_s12  ;;  %v655_v33 = vrot.slane %v648_v19, 1  ;;  %v458_v16 = vrot.slane %v447_v8, 1  ;;  %v460_v19 = vrot.slane %v446_v9, 1  ;;  %v457_v20 = vrot.slane %v445_v10, 1 }
  0xf4   : > { %v420_v61 = vrot.slane %v409_v34, 1 }
  0xf5   : > { %v1470_v42 = vsel %vm389_vm9, %v653_v32, %v655_v33  ;;  %v459_v27 = vsel %vm389_vm9, %v457_v20, %v458_v16  ;;  %v465_v32 = vrot.slane %v450_v17, 1  ;;  %v463_v33 = vrot.slane %v449_v18, 1 }
  0xf6   : > { %729 = vrot.lane.b32.xlu0 %v721_v40, %s1185_s20  ;;  %v748_v40 = vmul.f32 %v746_v53, %v1380_v4  ;;  %v426_v15 = vsel %vm389_vm9, %v420_v61, %v425_v7  ;;  %v711_v20 = vmul.f32 %v1398_v26, %v1388_v13 }
  0xf7   : > { %731 = vrot.lane.b32.xlu1 %v724_v39, %s1185_s20  ;;  %v1464_v39 = vsel %vm491_vm10, %v493_v21, %v495_v22  ;;  %v506_v21 = vstv %s972_s23 }
  0xf8   : > { %v510_v24 = vmul.f32 %v506_v21, %v1434_v51  ;;  %v509_v34 = vmul.f32 %v506_v21, %v1436_v54  ;;  %v508_v41 = vmul.f32 %v506_v21, %v503_v23  ;;  %v507_v45 = vmul.f32 %v506_v21, %v502_v25 }
  0xfa   : > { %338 = vrot.lane.b32.xlu0 %v330_v49, %s1184_s12  ;;  %v754_v49 = vrot.slane %v748_v40, 2  ;;  %v504_v40 = vld [vmem:[#allocation2 + $0x20] sm:$0x3]  ;;  %v522_v58 = vrot.slane %v508_v41, 2 }
  0xfb   : > { %340 = vrot.lane.b32.xlu1 %v331_v48, %s1184_s12  ;;  %v753_v48 = vrot.slane %v747_v5, 2  ;;  %v448_v5 = vmul.f32 %v444_v2, %v1434_v51 }
  0xfc   : > { %v1484_v53 = vsel %vm491_vm10, %v754_v49, %v756_v59  ;;  %v519_v59 = vrot.slane %v507_v45, 2 }
  0xfd   : > { %v461_v14 = vrot.slane %v448_v5, 1 }
  0xfe   : > { %363 = vrot.lane.b32.xlu0 %v355_v0, %s1185_s20  ;;  %v422_v0 = vrot.slane %v408_v46, 1  ;;  %v523_v46 = vrot.slane %v510_v24, 2 }
  0xff   : > { %365 = vrot.lane.b32.xlu1 %v356_v63, %s1185_s20  ;;  %v1479_v63 = vsel %vm491_vm10, %v753_v48, %v754_v49  ;;  %v462_v22 = vsel %vm389_vm9, %v460_v19, %v461_v14  ;;  %v466_v48 = vsel %vm389_vm9, %v461_v14, %v465_v32  ;;  %v464_v49 = vsel %vm389_vm9, %v458_v16, %v463_v33 }
 0x100   : > { %v712_v16 = vmul.f32 %v1398_v26, %v1386_v12  ;;  %v725_v32 = vrot.slane %v711_v20, 1  ;;  %v765_v26 = vld [vmem:[#allocation2 + $0x50] sm:$0x3] }
 0x102   : > { %342 = vrot.lane.b32.xlu0 %v332_v6, %s1184_s12  ;;  %v424_v6 = vsel %vm389_vm9, %v422_v0, %v423_v60  ;;  %v544_v60 = vstv %s973_s28  ;;  %v524_v0 = vsel %vm491_vm10, %v522_v58, %v523_v46 }
 0x103   : > { %344 = vrot.lane.b32.xlu1 %v333_v1, %s1184_s12  ;;  %v419_v1 = vrot.slane %v407_v47, 1  ;;  %v512_v47 = vmul.f32 %v506_v21, %v505_v37  ;;  %v548_v62 = vmul.f32 %v544_v60, %v1434_v51  ;;  %v547_v50 = vmul.f32 %v544_v60, %v1436_v54 }
 0x104   : > { %v546_v5 = vmul.f32 %v544_v60, %v503_v23  ;;  %v550_v9 = vmul.f32 %v544_v60, %v505_v37  ;;  %v549_v10 = vmul.f32 %v544_v60, %v504_v40  ;;  %v727_v23 = vrot.slane %v712_v16, 1 }
 0x105   : > { %v421_v55 = vsel %vm389_vm9, %v419_v1, %v420_v61  ;;  %v527_v61 = vrot.slane %v512_v47, 2  ;;  %v561_v7 = vrot.slane %v548_v62, 2  ;;  %v558_v51 = vrot.slane %v547_v50, 2 }
 0x106   : > { %367 = vrot.lane.b32.xlu0 %v357_v56, %s1185_s20  ;;  %v511_v56 = vmul.f32 %v506_v21, %v504_v40  ;;  %v565_v18 = vrot.slane %v550_v9, 2  ;;  %v563_v19 = vrot.slane %v549_v10, 2  ;;  %v764_v21 = vld [vmem:[#allocation2 + $0x38] sm:$0xfc]  ;;  %v728_v45 = vsel %vm389_vm9, %v723_v35, %v727_v23 }
 0x107   : > { %369 = vrot.lane.b32.xlu1 %v358_v52, %s1185_s20  ;;  %v520_v52 = vrot.slane %v509_v34, 2  ;;  %v766_v34 = vld [vmem:[#allocation2 + $0x58] sm:$0x3] }
 0x108   : > { %v525_v2 = vrot.slane %v511_v56, 2  ;;  %v566_v12 = vsel %vm491_vm10, %v561_v7, %v565_v18 }
 0x109   : > { %v521_v1 = vsel %vm491_vm10, %v519_v59, %v520_v52  ;;  %v805_v59 = vstv %s982_s24 }
 0x10a   : > { %429 = vrot.lane.b32.xlu0 %v421_v55, %s1184_s12  ;;  %v528_v55 = vsel %vm491_vm10, %v523_v46, %v527_v61  ;;  %v526_v8 = vsel %vm491_vm10, %v520_v52, %v525_v2  ;;  %v726_v46 = vsel %vm389_vm9, %v720_v36, %v725_v32  ;;  %v809_v35 = vmul.f32 %v805_v59, %v1378_v3 }
 0x10b   : > { %431 = vrot.lane.b32.xlu1 %v424_v6, %s1184_s12  ;;  %v545_v6 = vmul.f32 %v544_v60, %v502_v25  ;;  %v763_v25 = vld [vmem:[#allocation2 + $0x30] sm:$0xfc]  ;;  %v808_v30 = vmul.f32 %v805_v59, %v1380_v4  ;;  %v807_v36 = vmul.f32 %v805_v59, %v764_v21 }
 0x10c   : > { %v806_v61 = vmul.f32 %v805_v59, %v763_v25  ;;  %v822_v2 = vrot.slane %v809_v35, 2 }
 0x10d   : > { %v557_v14 = vrot.slane %v545_v6, 2  ;;  %v819_v50 = vrot.slane %v808_v30, 2 }
 0x10e   : > { %433 = vrot.lane.b32.xlu0 %v426_v15, %s1184_s12  ;;  %v818_v6 = vrot.slane %v806_v61, 2 }
 0x10f   : > { %435 = vrot.lane.b32.xlu1 %v428_v11, %s1184_s12  ;;  %v560_v11 = vrot.slane %v546_v5, 2  ;;  %v559_v17 = vsel %vm491_vm10, %v557_v14, %v558_v51  ;;  %v810_v5 = vmul.f32 %v805_v59, %v765_v26 }
 0x111   : > { %v562_v15 = vsel %vm491_vm10, %v560_v11, %v561_v7  ;;  %v820_v7 = vsel %vm491_vm10, %v818_v6, %v819_v50 }
 0x112   : > { %467 = vrot.lane.b32.xlu0 %v459_v27, %s1185_s20  ;;  %v564_v27 = vsel %vm491_vm10, %v558_v51, %v563_v19  ;;  %v824_v51 = vrot.slane %v810_v5, 2 }
 0x113   : > { %469 = vrot.lane.b32.xlu1 %v462_v22, %s1185_s20  ;;  %v767_v22 = vstv %s981_s29 }
 0x114   : > { %v771_v24 = vmul.f32 %v767_v22, %v1378_v3  ;;  %v770_v33 = vmul.f32 %v767_v22, %v1380_v4  ;;  %v769_v13 = vmul.f32 %v767_v22, %v764_v21  ;;  %v768_v37 = vmul.f32 %v767_v22, %v763_v25 }
 0x115   : > { %v773_v41 = vmul.f32 %v767_v22, %v766_v34  ;;  %v821_v3 = vrot.slane %v807_v36, 2  ;;  %v825_v10 = vsel %vm491_vm10, %v819_v50, %v824_v51 }
 0x116   : > { %471 = vrot.lane.b32.xlu0 %v464_v49, %s1185_s20  ;;  %v784_v40 = vrot.slane %v771_v24, 2  ;;  %v781_v47 = vrot.slane %v770_v33, 2  ;;  %v783_v49 = vrot.slane %v769_v13, 2  ;;  %v780_v52 = vrot.slane %v768_v37, 2 }
 0x117   : > { %473 = vrot.lane.b32.xlu1 %v466_v48, %s1185_s20  ;;  %v772_v48 = vmul.f32 %v767_v22, %v765_v26  ;;  %v788_v58 = vrot.slane %v773_v41, 2  ;;  %v319_v13 = vstv %s316_s27  ;;  %v314_v41 = vstv %s313_s6 }
 0x118   : > { %v785_v56 = vsel %vm491_vm10, %v783_v49, %v784_v40  ;;  %v782_v29 = vsel %vm491_vm10, %v780_v52, %v781_v47 }
 0x119   : > { %v786_v60 = vrot.slane %v772_v48, 2  ;;  %v789_v62 = vsel %vm491_vm10, %v784_v40, %v788_v58  ;;  %v320_v40 = vmul.f32 %v1428_v43, %v319_v13 }
 0x11a   : > { %529 = vrot.lane.b32.xlu0 %v521_v1, %s1184_s12 }
 0x11b   : > { %531 = vrot.lane.b32.xlu1 %v524_v0, %s1184_s12  ;;  %v811_v0 = vmul.f32 %v805_v59, %v766_v34  ;;  %v787_v1 = vsel %vm491_vm10, %v781_v47, %v786_v60  ;;  %v322_v48 = vadd.f32 %v320_v40, %v314_v41 }
 0x11e   : > { %533 = vrot.lane.b32.xlu0 %v526_v8, %s1184_s12  ;;  %v826_v8 = vrot.slane %v811_v0, 2 }
 0x11f   : > { %535 = vrot.lane.b32.xlu1 %v528_v55, %s1184_s12  ;;  %v823_v55 = vsel %vm491_vm10, %v821_v3, %v822_v2 }
 0x120   : > { %v827_v9 = vsel %vm491_vm10, %v822_v2, %v826_v8 }
 0x122   : > { %567 = vrot.lane.b32.xlu0 %v559_v17, %s1185_s20 }
 0x123   : > { %569 = vrot.lane.b32.xlu1 %v562_v15, %s1185_s20 }
 0x126   : > { %571 = vrot.lane.b32.xlu0 %v564_v27, %s1185_s20 }
 0x127   : > { %573 = vrot.lane.b32.xlu1 %v566_v12, %s1185_s20 }
 0x12a   : > { %733 = vrot.lane.b32.xlu0 %v726_v46, %s1185_s20 }
 0x12b   : > { %735 = vrot.lane.b32.xlu1 %v728_v45, %s1185_s20 }
 0x12e   : > { %790 = vrot.lane.b32.xlu0 %v782_v29, %s1184_s12  ;;  %v321_v29 = vmul.f32 %v1436_v54, %v319_v13 }
 0x12f   : > { %792 = vrot.lane.b32.xlu1 %v785_v56, %s1184_s12 }
 0x130   : > { %v323_v36 = vadd.f32 %v321_v29, %v314_v41 }
 0x132   : > { %794 = vrot.lane.b32.xlu0 %v787_v1, %s1184_s12 }
 0x133   : > { %796 = vrot.lane.b32.xlu1 %v789_v62, %s1184_s12  ;;  %s974_s12 = sld [smem:[#allocation8 + $0x9]] }
 0x136   : > { %828 = vrot.lane.b32.xlu0 %v820_v7, %s1185_s20 }
 0x137   : > { %830 = vrot.lane.b32.xlu1 %v823_v55, %s1185_s20 }
 0x13a   : > { %832 = vrot.lane.b32.xlu0 %v825_v10, %s1185_s20 }
 0x13b   : > { %834 = vrot.lane.b32.xlu1 %v827_v9, %s1185_s20  ;;  %s965_s20 = sshll.u32 %s1332_s18, 4 }
 0x13c   : > { %s203_s30 = scalar_lea.vmem [#allocation9], %s965_s20 }
 0x13d   : > { %s870_s4 = sshll.u32 %s203_s30, 4  ;;  %s1624_s4 = int_to_ptr.vmem [resolvable:$true] %s870_s4 }
 0x13e   : > { %s1108_s10 = scalar_lea.vmem %s1624_s4, 256  ;;  %p1115_p8 = scmp.lt.s32.totalorder %s1624_s4, %s1113_s11 }
 0x13f   : > { %p1109_p12 = scmp.ne.s32.totalorder %s1624_s4, %s1108_s10  ;;  %p1116_p9 = scmp.lt.s32.totalorder %s1114_s13, %s1108_s10 }
 0x141   : > { %p1110_p2 = pnand %p1109_p12, %p1686_p0  ;;  %p1117_p10 = por %p1116_p9, %p1115_p8 }
 0x143   : > { %p1111_p7 = pneg %p1110_p2 }
 0x145   : > { %p1118_p1 = pnand %p1117_p10, %p1111_p7 }
 0x147   : > { %v604_v14 = vpop.permute.xlu0 %603 }
 0x148   : > { %v606_v11 = vpop.permute.xlu1 %605 }
 0x149   : > { %v1558_v15 = vsel %vm346_vm11, %v604_v14, %v606_v11 }
 0x14b   : > { %v628_v17 = vpop.permute.xlu0 %627 }
 0x14c   : > { %v630_v16 = vpop.permute.xlu1 %629 }
 0x14d   : > { %v1561_v18 = vsel %vm371_vm12, %v628_v17, %v630_v16 }
 0x158   : > { %v608_v20 = vpop.permute.xlu0 %607 }
 0x159   : > { %v610_v19 = vpop.permute.xlu1 %609 }
 0x15a   : > { %v1564_v21 = vsel %vm346_vm11, %v608_v20, %v610_v19 }
 0x15c   : > { %v632_v23 = vpop.permute.xlu0 %631 }
 0x15d   : > { %v634_v22 = vpop.permute.xlu1 %633 }
 0x15e   : > { %v1567_v24 = vsel %vm371_vm12, %v632_v23, %v634_v22 }
 0x160   : > { %v692_v12 = vpop.permute.xlu0 %691 }
 0x161   : > { %v694_v25 = vpop.permute.xlu1 %693 }
 0x162   : > { %v1570_v27 = vsel %vm346_vm11, %v692_v12, %v694_v25 }
 0x164   : > { %v696_v33 = vpop.permute.xlu0 %695 }
 0x165   : > { %v698_v32 = vpop.permute.xlu1 %697 }
 0x166   : > { %v1573_v34 = vsel %vm346_vm11, %v696_v33, %v698_v32  ;;  %v584_v33 = vstv %s974_s12 }
 0x168   : > { %v1577_v37 = vpop.permute.xlu0 %729 }
 0x169   : > { %v1575_v26 = vpop.permute.xlu1 %731 }
 0x16c   : > { %v339_v46 = vpop.permute.xlu0 %338 }
 0x16d   : > { %v341_v45 = vpop.permute.xlu1 %340 }
 0x16e   : > { %v347_v47 = vsel %vm346_vm11, %v339_v46, %v341_v45  ;;  %v585_v46 = vmul.f32 %v1362_v57, %v584_v33 }
 0x16f   : > { %v351_v49 = vadd.f32 %v347_v47, %v322_v48 }
 0x170   : > { %v364_v56 = vpop.permute.xlu0 %363 }
 0x171   : > { %v366_v52 = vpop.permute.xlu1 %365 }
 0x172   : > { %v372_v58 = vsel %vm371_vm12, %v364_v56, %v366_v52 }
 0x173   : > { %v376_v59 = vadd.f32 %v372_v58, %v351_v49 }
 0x174   : > { %v343_v35 = vpop.permute.xlu0 %342 }
 0x175   : > { %v345_v60 = vpop.permute.xlu1 %344  ;;  %v397_v30 = vadd.f32 %v1454_v28, %v376_v59  ;;  %v586_v59 = vmul.f32 %v1380_v4, %v584_v33  ;;  %v737_v4 = vsel %vm371_vm12, %v1577_v37, %v1575_v26 }
 0x176   : > { %v348_v43 = vsel %vm346_vm11, %v343_v35, %v345_v60 }
 0x177   : > { %v352_v61 = vadd.f32 %v348_v43, %v323_v36 }
 0x178   : > { %v368_v0 = vpop.permute.xlu0 %367 }
 0x179   : > { %v370_v62 = vpop.permute.xlu1 %369 }
 0x17a   : > { %v373_v1 = vsel %vm371_vm12, %v368_v0, %v370_v62 }
 0x17b   : > { %v377_v2 = vadd.f32 %v373_v1, %v352_v61 }
 0x17c   : > { %v430_v5 = vpop.permute.xlu0 %429 }
 0x17d   : > { %v432_v50 = vpop.permute.xlu1 %431  ;;  %v398_v3 = vadd.f32 %v1457_v31, %v377_v2 }
 0x17e   : > { %v437_v54 = vsel %vm346_vm11, %v430_v5, %v432_v50 }
 0x17f   : > { %v441_v7 = vadd.f32 %v437_v54, %v397_v30 }
 0x180   : > { %v434_v55 = vpop.permute.xlu0 %433 }
 0x181   : > { %v436_v6 = vpop.permute.xlu1 %435 }
 0x182   : > { %v438_v51 = vsel %vm346_vm11, %v434_v55, %v436_v6 }
 0x183   : > { %v442_v11 = vadd.f32 %v438_v51, %v398_v3 }
 0x184   : > { %v468_v28 = vpop.permute.xlu0 %467 }
 0x185   : > { %v470_v8 = vpop.permute.xlu1 %469 }
 0x186   : > { %v475_v9 = vsel %vm371_vm12, %v468_v28, %v470_v8 }
 0x187   : > { %v479_v10 = vadd.f32 %v475_v9, %v441_v7 }
 0x188   : > { %v472_v16 = vpop.permute.xlu0 %471 }
 0x189   : > { %v474_v14 = vpop.permute.xlu1 %473  ;;  %v499_v17 = vadd.f32 %v1461_v38, %v479_v10 }
 0x18a   : > { %v476_v19 = vsel %vm371_vm12, %v472_v16, %v474_v14 }
 0x18b   : > { %v480_v31 = vadd.f32 %v476_v19, %v442_v11 }
 0x18c   : > { %v530_v22 = vpop.permute.xlu0 %529 }
 0x18d   : > { %v532_v20 = vpop.permute.xlu1 %531  ;;  %v500_v23 = vadd.f32 %v1464_v39, %v480_v31 }
 0x18e   : > { %v537_v32 = vsel %vm346_vm11, %v530_v22, %v532_v20 }
 0x18f   : > { %v541_v13 = vadd.f32 %v537_v32, %v499_v17 }
 0x190   : > { %v534_v12 = vpop.permute.xlu0 %533 }
 0x191   : > { %v536_v25 = vpop.permute.xlu1 %535 }
 0x192   : > { %v538_v45 = vsel %vm346_vm11, %v534_v12, %v536_v25 }
 0x193   : > { %v542_v48 = vadd.f32 %v538_v45, %v500_v23 }
 0x194   : > { %v568_v41 = vpop.permute.xlu0 %567 }
 0x195   : > { %v570_v40 = vpop.permute.xlu1 %569 }
 0x196   : > { %v575_v38 = vsel %vm371_vm12, %v568_v41, %v570_v40 }
 0x197   : > { %v579_v47 = vadd.f32 %v575_v38, %v541_v13 }
 0x198   : > { %v572_v56 = vpop.permute.xlu0 %571 }
 0x199   : > { %v587_v49 = vadd.f32 %v585_v46, %v579_v47  ;;  %v574_v52 = vpop.permute.xlu1 %573 }
 0x19a   : > { %v576_v39 = vsel %vm371_vm12, %v572_v56, %v574_v52 }
 0x19b   : > { %v615_v58 = vadd.f32 %v1558_v15, %v587_v49  ;;  %v580_v29 = vadd.f32 %v576_v39, %v542_v48 }
 0x19c   : > { %v734_v43 = vpop.permute.xlu0 %733 }
 0x19d   : > { %v639_v60 = vadd.f32 %v1561_v18, %v615_v58  ;;  %v588_v35 = vadd.f32 %v586_v59, %v580_v29  ;;  %v736_v30 = vpop.permute.xlu1 %735 }
 0x19f   : > { %v616_v36 = vadd.f32 %v1564_v21, %v588_v35  ;;  %v659_v57 = vadd.f32 %v1473_v44, %v639_v60  ;;  %v738_v44 = vsel %vm371_vm12, %v734_v43, %v736_v30 }
 0x1a0   : > { %v791_v1 = vpop.permute.xlu0 %790 }
 0x1a1   : > { %v640_v61 = vadd.f32 %v1567_v24, %v616_v36  ;;  %v793_v62 = vpop.permute.xlu1 %792  ;;  %v703_v0 = vadd.f32 %v1570_v27, %v659_v57 }
 0x1a2   : > { %v798_v3 = vsel %vm346_vm11, %v791_v1, %v793_v62 }
 0x1a3   : > { %v660_v15 = vadd.f32 %v1470_v42, %v640_v61  ;;  %v741_v18 = vadd.f32 %v737_v4, %v703_v0 }
 0x1a4   : > { %v795_v5 = vpop.permute.xlu0 %794 }
 0x1a5   : > { %v704_v2 = vadd.f32 %v1573_v34, %v660_v15  ;;  %v760_v50 = vadd.f32 %v1479_v63, %v741_v18  ;;  %v797_v21 = vpop.permute.xlu1 %796 }
 0x1a6   : > { %v799_v37 = vsel %vm346_vm11, %v795_v5, %v797_v21 }
 0x1a7   : > { %v742_v24 = vadd.f32 %v738_v44, %v704_v2  ;;  %v802_v27 = vadd.f32 %v798_v3, %v760_v50 }
 0x1a8   : > { %v829_v54 = vpop.permute.xlu0 %828 }
 0x1a9   : > { %v761_v6 = vadd.f32 %v1484_v53, %v742_v24  ;;  %v831_v55 = vpop.permute.xlu1 %830 }
 0x1aa   : > { %v836_v26 = vsel %vm371_vm12, %v829_v54, %v831_v55 }
 0x1ab   : > { %v840_v42 = vadd.f32 %v836_v26, %v802_v27  ;;  %v803_v34 = vadd.f32 %v799_v37, %v761_v6 }
 0x1ac   : > { %v833_v8 = vpop.permute.xlu0 %832 }
 0x1ad   : > { %v983_v63 = vmul.f32 -1.442695, %v840_v42  ;;  %v835_v7 = vpop.permute.xlu1 %834 }
 0x1ae   : > { %v837_v28 = vsel %vm371_vm12, %v833_v8, %v835_v7 }
 0x1af   : > { %1057 = vpow2.f32 %v983_v63  ;;  %v841_v51 = vadd.f32 %v837_v28, %v803_v34 }
 0x1b1   : > { %v984_v9 = vmul.f32 -1.442695, %v841_v51 }
 0x1b3   : > { %1059 = vpow2.f32 %v984_v9 }
 0x1bc   : > { %v1058_v53 = vpop.eup %1057 }
 0x1bd   : > { %v848_v10 = vadd.f32 1.0, %v1058_v53 }
 0x1bf   : > { %1061 = vrcp.f32 %v848_v10 }
 0x1c0   : > { %v1060_v11 = vpop.eup %1059 }
 0x1c1   : > { %v849_v14 = vadd.f32 1.0, %v1060_v11 }
 0x1c3   : > { %1063 = vrcp.f32 %v849_v14 }
 0x1cc   : > { %v1062_v16 = vpop.eup %1061 }
 0x1cd   : > { %854 = vst [vmem:[%s203_s30] sm:$0xff] %v1062_v16 }
 0x1d0   : > { %v1064_v17 = vpop.eup %1063 }
 0x1d1   : > { %855 = vst [vmem:[%s203_s30 + $0x8] sm:$0xff] %v1064_v17 }
 0x1d2   : > { %1121 = shalt.err (!%p1118_p1)
}
 0x1d3   : > { %s1122_s23 = scalar_lea.hbm %s1622_s8, 256  ;;  %s1126_s24 = scalar_lea.hbm %s1670_s3, 512 }
 0x1d4   : > { %p1123_p4 = scmp.ne.s32.totalorder %s1622_s8, %s1122_s23  ;;  %p1127_p6 = scmp.lt.s32.totalorder %s1622_s8, %s1670_s3 }
 0x1d5   : > { %p1128_p13 = scmp.lt.s32.totalorder %s1126_s24, %s1122_s23 }
 0x1d6   : > { %p1124_p11 = pnand %p1123_p4, %p1686_p0 }
 0x1d7   : > { %p1129_p3 = por %p1128_p13, %p1127_p6 }
 0x1d8   : > { %p1125_p5 = pneg %p1124_p11 }
 0x1da   : > { %p1130_p12 = pnand %p1129_p3, %p1125_p5 }
 0x1dc   : > { %1133 = shalt.err (!%p1130_p12)
}
 0x1dd   : > { %s1187_s12 = smov 128   ;;  %s1188_s20 = smov 8  }
 0x1de   : > { %998 = dma.vmem_to_hbm [thread:$0]  (%p1686_p0), %s1624_s4, 256, %s1622_s8, %s857_s9, %s1187_s12, %s1187_s12, %s1188_s20  }
 0x1df PF: > { %s885_s21 = sand.u32 1, %s1164_s14   ;;  %p1687_p2 = scmp.ne.s32.totalorder %s1678_s26, 0 }
 0x1e0   : > { %p1688_p7 = scmp.ge.s32.totalorder %s1176_s17, 2  ;;  %s886_s30 = scalar_lea.sflag [#allocation6], %s885_s21 }
 0x1e2   : > { %p1009_p8 = pnand %p1688_p7, %p1687_p2 }
 0x1e4   : > { %p1010_p9 = pneg %p1009_p8 }
 0x1e6   : > { %1159 = dma.done.wait (%p1010_p9), %s886_s30, 256  }
 0x1e7   : > { %1161 = vsyncadd (%p1010_p9), %s886_s30, 4294967040  ;;  %p18_p10 = scmp.ge.s32.totalorder %s1237_s19, 4   ;;  %s1689_s14 = smov %s1168_s15 }
 0x1e8   : > { %s1690_s15 = smov %s1172_s16  ;;  %s1691_s16 = smov %s1249_s22 }
 0x1e9   : > { %s1692_s17 = smov %s1237_s19  ;;  %20 = sbr.rel (!%p18_p10) target bundleno = 8 (0x8), region = 83 }
 0x1ee   :  { %891 = vsyncpa [#allocation5], 1 }
 0x1ef   :  { %893 = vsyncpa [#allocation5 + $0x1], 1 }
 0x1f0   :  { %894 = vsyncpa [#allocation6], 1 }
 0x1f1   :  { %896 = vsyncpa [#allocation6 + $0x1], 1 }
 0x1f2   :  { %897 = vsyncpa [#allocation7], 1 }
 0x1f3   :  { %899 = vsyncpa [#allocation7 + $0x1], 1 }

</bundles_post_ra>
